<compile_context>
chip_gen: v6e
topology: v6e:2x2x1
jax: 0.10.0
libtpu: 0.0.40
codegen_flags: <defaults>
</compile_context>

<pallas_src>
import math

import jax
import jax.numpy as jnp
from jax.experimental import pallas as pl
from jax.experimental.pallas import tpu as pltpu

LANES = 128
SUBLANES = 8
CHUNK_ROWS = 256          # rows per in-kernel chunk (bounds VMEM temporaries)
MAX_TILE_ROWS = 2048      # rows of 128 lanes per grid step (4 planes -> 4 MiB)

_TAN_PI_8 = 0.41421356237309503
_TAN_3PI_8 = 2.414213562373095
_PI = math.pi
_PI_2 = math.pi / 2.0
_PI_4 = math.pi / 4.0


def _detect_num_shards():
    """Use a 2-way shard axis only on dual-TensorCore (v7x-class) parts."""
    try:
        kind = jax.devices()[0].device_kind.lower()
    except Exception:
        return 1
    return 2 if ("v7" in kind or "7x" in kind) else 1


NUM_SHARDS = _detect_num_shards()


def _atan2(y, x):
    """Principal-value atan2 from VPU ops + ONE divide (cephes atanf polynomial)."""
    ax = jnp.abs(x)
    ay = jnp.abs(y)
    hi = ay > _TAN_3PI_8 * ax            # |y/x| > tan(3pi/8)
    mid = ay > _TAN_PI_8 * ax            # |y/x| > tan(pi/8)   (hi implies mid)
    num = jnp.where(hi, -ax, jnp.where(mid, ay - ax, ay))
    den = jnp.where(hi, ay, jnp.where(mid, ay + ax, ax))
    den = jnp.where(den == 0.0, 1.0, den)   # only when ax == ay == 0 -> t = 0
    r = num / den                           # the single divide
    offs = jnp.where(hi, _PI_2, jnp.where(mid, _PI_4, 0.0))
    z = r * r
    p = (((8.05374449538e-2 * z - 1.38776856032e-1) * z
          + 1.99777106478e-1) * z - 3.33329491539e-1)
    t = offs + r + r * z * p
    t = jnp.where(x < 0.0, _PI - t, t)      # left half-plane
    t = jnp.where(y < 0.0, -t, t)           # lower half-plane
    return t


def _make_kernel(tile_rows, chunk_rows):
    n_full = tile_rows // chunk_rows
    tail_rows = tile_rows - n_full * chunk_rows   # multiple of SUBLANES

    def _accumulate(planes_ref, o_ref, row0, nrows):
        xr = planes_ref[0, pl.ds(row0, nrows), :]
        xi = planes_ref[1, pl.ds(row0, nrows), :]
        yr = planes_ref[2, pl.ds(row0, nrows), :]
        yi = planes_ref[3, pl.ds(row0, nrows), :]
        # 0.5*log(|x|^2/|y|^2) == log|x| - log|y|   (one log + one divide)
        d_logmag = 0.5 * jnp.log((xr * xr + xi * xi) / (yr * yr + yi * yi))
        d_angle = _atan2(xi, xr) - _atan2(yi, yr)
        terms = d_logmag * d_logmag + d_angle * d_angle          # (nrows, 128)
        # Fold 8-row groups with plain VPU adds into the resident accumulator.
        o_ref[...] += jnp.sum(terms.reshape(-1, SUBLANES, LANES), axis=0)

    def kernel(planes_ref, o_ref):
        # o_ref (8,128) stays resident across the inner ("arbitrary") grid axis
        # and acts as a per-(sublane, lane) vector accumulator.
        @pl.when(pl.program_id(1) == 0)
        def _():
            o_ref[...] = jnp.zeros_like(o_ref)

        if n_full == 1 and tail_rows == 0:
            # Small tile: single static chunk, fully static indexing.
            _accumulate(planes_ref, o_ref, 0, chunk_rows)
        else:
            @pl.loop(0, n_full)
            def _(c):
                row0 = pl.multiple_of(c * chunk_rows, chunk_rows)
                _accumulate(planes_ref, o_ref, row0, chunk_rows)

            if tail_rows:
                _accumulate(planes_ref, o_ref, n_full * chunk_rows, tail_rows)

    return kernel


def _round_up(a, b):
    return -(-a // b) * b


@jax.jit
def cv_log_error(x, y):
    """sum(|log(x) - log(y)|^2) for complex-valued x, y of matching shape."""
    assert x.shape == y.shape
    xr = jnp.real(x).astype(jnp.float32).ravel()
    xi = jnp.imag(x).astype(jnp.float32).ravel()
    yr = jnp.real(y).astype(jnp.float32).ravel()
    yi = jnp.imag(y).astype(jnp.float32).ravel()
    n = xr.shape[0]

    # One stacked, lane-dense HBM operand (4 planes) -> a single DMA stream per
    # grid step.  real/imag/stack/pad/reshape fuse into one XLA copy pass.
    planes = jnp.stack([xr, xi, yr, yi], axis=0)              # (4, n)

    rows = _round_up(pl.cdiv(n, LANES), SUBLANES)             # 8x128 f32 quantum
    shards = NUM_SHARDS if rows > MAX_TILE_ROWS else 1
    tiles = max(1, pl.cdiv(rows, MAX_TILE_ROWS))
    tiles = _round_up(tiles, shards)                          # even split over TCs
    tile_rows = _round_up(pl.cdiv(rows, tiles), SUBLANES)     # balanced tiles
    rows = tiles * tile_rows                                  # pad <= 8*tiles rows
    tiles_per_shard = tiles // shards
    chunk_rows = min(CHUNK_ROWS, tile_rows)

    n_pad = rows * LANES
    # Pad with 1.0: padded x and y elements both become (1 + 1j) -> log diff == 0.
    planes = jnp.pad(planes, ((0, 0), (0, n_pad - n)), constant_values=1.0)
    planes = planes.reshape(4, rows, LANES)

    in_spec = pl.BlockSpec(
        (4, tile_rows, LANES),
        lambda s, i, tps=tiles_per_shard: (0, s * tps + i, 0))
    out_spec = pl.BlockSpec((SUBLANES, LANES), lambda s, i: (s, 0))

    cost = pl.CostEstimate(
        flops=90 * n_pad,                     # two 1-divide atan2 chains + mag/log
        transcendentals=4 * n_pad,            # 3 divides + 1 log per element
        bytes_accessed=4 * n_pad * 4 + shards * SUBLANES * LANES * 4,
    )

    partials = pl.pallas_call(
        _make_kernel(tile_rows, chunk_rows),
        out_shape=jax.ShapeDtypeStruct((shards * SUBLANES, LANES), jnp.float32),
        grid_spec=pltpu.PrefetchScalarGridSpec(
            num_scalar_prefetch=0,
            grid=(shards, tiles_per_shard),
            in_specs=[in_spec],
            out_specs=out_spec,
        ),
        compiler_params=pltpu.CompilerParams(
            dimension_semantics=("parallel", "arbitrary"),
            vmem_limit_bytes=32 * 1024 * 1024),
        cost_estimate=cost,
    )(planes)

    # Tiny final cross-lane reduction (<= 2048 values) stays in XLA.
    return jnp.sum(partials)


def _make_complex(key, shape):
    k1, k2 = jax.random.split(key)
    return (jax.random.normal(k1, shape, jnp.float32)
            + 1j * jax.random.normal(k2, shape, jnp.float32)).astype(jnp.complex64)


if __name__ == "__main__":
    key = jax.random.PRNGKey(0)
    kx, ky, kx2, ky2 = jax.random.split(key, 4)

    # Small NCHW case consistent with the module (single-tile, single-chunk path).
    shape = (2, 4, 16, 16)
    x = _make_complex(kx, shape)
    y = _make_complex(ky, shape)
    loss = cv_log_error(x, y)
    jax.block_until_ready(loss)
    ref = jnp.sum(jnp.abs(jnp.log(x) - jnp.log(y)) ** 2)
    assert jnp.allclose(loss, ref, rtol=1e-4, atol=1e-2), (loss, ref)

    # Larger case exercising padding, the multi-tile grid, the in-kernel chunk
    # loop (pl.loop) and the static tail chunk.
    shape2 = (2, 4, 190, 190)
    x2 = _make_complex(kx2, shape2)
    y2 = _make_complex(ky2, shape2)
    loss2 = cv_log_error(x2, y2)
    jax.block_until_ready(loss2)
    ref2 = jnp.sum(jnp.abs(jnp.log(x2) - jnp.log(y2)) ** 2)
    assert jnp.allclose(loss2, ref2, rtol=5e-4, atol=1e-1), (loss2, ref2)

    print("KERNEL_OK")
</pallas_src>

<mosaic_0001>
module attributes {stable_mosaic.version = 11 : i64} {
  func.func @kernel(%arg0: i32, %arg1: i32, %arg2: memref<4x16x128xf32, #tpu.memory_space<vmem>>, %arg3: memref<8x128xf32, #tpu.memory_space<vmem>>) attributes {dimension_semantics = [#tpu.dimension_semantics<parallel>, #tpu.dimension_semantics<arbitrary>], iteration_bounds = array<i64: 1, 1>, scalar_prefetch = 0 : i64, scratch_operands = 0 : i64, tpu.core_type = #tpu.core_type<tc>, window_params = [{transform_indices = @transform_0, window_bounds = array<i64: 4, 16, 128>}, {transform_indices = @transform_1, window_bounds = array<i64: 8, 128>}]} {
    %c0_i32 = arith.constant 0 : i32
    %0 = arith.cmpi eq, %arg1, %c0_i32 : i32
    %1 = arith.extui %0 : i1 to i32
    %c0_i32_0 = arith.constant 0 : i32
    %2 = arith.cmpi ne, %1, %c0_i32_0 : i32
    scf.if %2 {
      %cst_46 = arith.constant 0.000000e+00 : f32
      %132 = vector.broadcast %cst_46 : f32 to vector<8x128xf32>
      %c0_47 = arith.constant 0 : index
      %c0_48 = arith.constant 0 : index
      %133 = vector.load %arg3[%c0_47, %c0_48] : memref<8x128xf32, #tpu.memory_space<vmem>>, vector<8x128xf32>
      tpu.vector_store %arg3[%c0_47, %c0_48], %132 {strides = array<i32>} : memref<8x128xf32, #tpu.memory_space<vmem>>, vector<8x128xf32>,
    } else {
    }
    %c0 = arith.constant 0 : index
    %c0_1 = arith.constant 0 : index
    %c0_2 = arith.constant 0 : index
    %3 = vector.load %arg2[%c0, %c0_1, %c0_2] : memref<4x16x128xf32, #tpu.memory_space<vmem>>, vector<1x16x128xf32>
    %4 = vector.shape_cast %3 : vector<1x16x128xf32> to vector<16x128xf32>
    %c1 = arith.constant 1 : index
    %c0_3 = arith.constant 0 : index
    %c0_4 = arith.constant 0 : index
    %5 = vector.load %arg2[%c1, %c0_3, %c0_4] : memref<4x16x128xf32, #tpu.memory_space<vmem>>, vector<1x16x128xf32>
    %6 = vector.shape_cast %5 : vector<1x16x128xf32> to vector<16x128xf32>
    %c2 = arith.constant 2 : index
    %c0_5 = arith.constant 0 : index
    %c0_6 = arith.constant 0 : index
    %7 = vector.load %arg2[%c2, %c0_5, %c0_6] : memref<4x16x128xf32, #tpu.memory_space<vmem>>, vector<1x16x128xf32>
    %8 = vector.shape_cast %7 : vector<1x16x128xf32> to vector<16x128xf32>
    %c3 = arith.constant 3 : index
    %c0_7 = arith.constant 0 : index
    %c0_8 = arith.constant 0 : index
    %9 = vector.load %arg2[%c3, %c0_7, %c0_8] : memref<4x16x128xf32, #tpu.memory_space<vmem>>, vector<1x16x128xf32>
    %10 = vector.shape_cast %9 : vector<1x16x128xf32> to vector<16x128xf32>
    %11 = arith.mulf %4, %4 : vector<16x128xf32>
    %12 = arith.mulf %6, %6 : vector<16x128xf32>
    %13 = arith.addf %11, %12 : vector<16x128xf32>
    %14 = arith.mulf %8, %8 : vector<16x128xf32>
    %15 = arith.mulf %10, %10 : vector<16x128xf32>
    %16 = arith.addf %14, %15 : vector<16x128xf32>
    %17 = arith.divf %13, %16 : vector<16x128xf32>
    %18 = math.log %17 : vector<16x128xf32>
    %cst = arith.constant 5.000000e-01 : f32
    %19 = vector.broadcast %cst : f32 to vector<16x128xf32>
    %20 = arith.mulf %19, %18 : vector<16x128xf32>
    %21 = math.absf %4 : vector<16x128xf32>
    %22 = math.absf %6 : vector<16x128xf32>
    %cst_9 = arith.constant 2.41421366 : f32
    %23 = vector.broadcast %cst_9 : f32 to vector<16x128xf32>
    %24 = arith.mulf %23, %21 : vector<16x128xf32>
    %25 = arith.cmpf ogt, %22, %24 : vector<16x128xf32>
    %cst_10 = arith.constant 0.414213568 : f32
    %26 = vector.broadcast %cst_10 : f32 to vector<16x128xf32>
    %27 = arith.mulf %26, %21 : vector<16x128xf32>
    %28 = arith.cmpf ogt, %22, %27 : vector<16x128xf32>
    %cst_11 = arith.constant 0.000000e+00 : f32
    %29 = vector.broadcast %cst_11 : f32 to vector<16x128xf32>
    %30 = arith.subf %29, %21 : vector<16x128xf32>
    %31 = arith.subf %22, %21 : vector<16x128xf32>
    %32 = arith.select %28, %31, %22 : vector<16x128xi1>, vector<16x128xf32>
    %33 = arith.select %25, %30, %32 : vector<16x128xi1>, vector<16x128xf32>
    %34 = arith.addf %22, %21 : vector<16x128xf32>
    %35 = arith.select %28, %34, %21 : vector<16x128xi1>, vector<16x128xf32>
    %36 = arith.select %25, %22, %35 : vector<16x128xi1>, vector<16x128xf32>
    %cst_12 = arith.constant 0.000000e+00 : f32
    %37 = vector.broadcast %cst_12 : f32 to vector<16x128xf32>
    %38 = arith.cmpf oeq, %36, %37 : vector<16x128xf32>
    %cst_13 = arith.constant 1.000000e+00 : f32
    %39 = vector.broadcast %cst_13 : f32 to vector<16x128xf32>
    %40 = arith.select %38, %39, %36 : vector<16x128xi1>, vector<16x128xf32>
    %41 = arith.divf %33, %40 : vector<16x128xf32>
    %cst_14 = arith.constant 0.785398185 : f32
    %cst_15 = arith.constant 0.000000e+00 : f32
    %42 = vector.broadcast %cst_14 : f32 to vector<16x128xf32>
    %43 = vector.broadcast %cst_15 : f32 to vector<16x128xf32>
    %44 = arith.select %28, %42, %43 : vector<16x128xi1>, vector<16x128xf32>
    %cst_16 = arith.constant 1.57079637 : f32
    %45 = vector.broadcast %cst_16 : f32 to vector<16x128xf32>
    %46 = arith.select %25, %45, %44 : vector<16x128xi1>, vector<16x128xf32>
    %47 = arith.mulf %41, %41 : vector<16x128xf32>
    %cst_17 = arith.constant 0.0805374458 : f32
    %48 = vector.broadcast %cst_17 : f32 to vector<16x128xf32>
    %49 = arith.mulf %48, %47 : vector<16x128xf32>
    %cst_18 = arith.constant 0.138776854 : f32
    %50 = vector.broadcast %cst_18 : f32 to vector<16x128xf32>
    %51 = arith.subf %49, %50 : vector<16x128xf32>
    %52 = arith.mulf %51, %47 : vector<16x128xf32>
    %cst_19 = arith.constant 0.199777111 : f32
    %53 = vector.broadcast %cst_19 : f32 to vector<16x128xf32>
    %54 = arith.addf %52, %53 : vector<16x128xf32>
    %55 = arith.mulf %54, %47 : vector<16x128xf32>
    %cst_20 = arith.constant 0.333329499 : f32
    %56 = vector.broadcast %cst_20 : f32 to vector<16x128xf32>
    %57 = arith.subf %55, %56 : vector<16x128xf32>
    %58 = arith.addf %46, %41 : vector<16x128xf32>
    %59 = arith.mulf %41, %47 : vector<16x128xf32>
    %60 = arith.mulf %59, %57 : vector<16x128xf32>
    %61 = arith.addf %58, %60 : vector<16x128xf32>
    %cst_21 = arith.constant 0.000000e+00 : f32
    %62 = vector.broadcast %cst_21 : f32 to vector<16x128xf32>
    %63 = arith.cmpf olt, %4, %62 : vector<16x128xf32>
    %cst_22 = arith.constant 3.14159274 : f32
    %64 = vector.broadcast %cst_22 : f32 to vector<16x128xf32>
    %65 = arith.subf %64, %61 : vector<16x128xf32>
    %66 = arith.select %63, %65, %61 : vector<16x128xi1>, vector<16x128xf32>
    %cst_23 = arith.constant 0.000000e+00 : f32
    %67 = vector.broadcast %cst_23 : f32 to vector<16x128xf32>
    %68 = arith.cmpf olt, %6, %67 : vector<16x128xf32>
    %cst_24 = arith.constant 0.000000e+00 : f32
    %69 = vector.broadcast %cst_24 : f32 to vector<16x128xf32>
    %70 = arith.subf %69, %66 : vector<16x128xf32>
    %71 = arith.select %68, %70, %66 : vector<16x128xi1>, vector<16x128xf32>
    %72 = math.absf %8 : vector<16x128xf32>
    %73 = math.absf %10 : vector<16x128xf32>
    %cst_25 = arith.constant 2.41421366 : f32
    %74 = vector.broadcast %cst_25 : f32 to vector<16x128xf32>
    %75 = arith.mulf %74, %72 : vector<16x128xf32>
    %76 = arith.cmpf ogt, %73, %75 : vector<16x128xf32>
    %cst_26 = arith.constant 0.414213568 : f32
    %77 = vector.broadcast %cst_26 : f32 to vector<16x128xf32>
    %78 = arith.mulf %77, %72 : vector<16x128xf32>
    %79 = arith.cmpf ogt, %73, %78 : vector<16x128xf32>
    %cst_27 = arith.constant 0.000000e+00 : f32
    %80 = vector.broadcast %cst_27 : f32 to vector<16x128xf32>
    %81 = arith.subf %80, %72 : vector<16x128xf32>
    %82 = arith.subf %73, %72 : vector<16x128xf32>
    %83 = arith.select %79, %82, %73 : vector<16x128xi1>, vector<16x128xf32>
    %84 = arith.select %76, %81, %83 : vector<16x128xi1>, vector<16x128xf32>
    %85 = arith.addf %73, %72 : vector<16x128xf32>
    %86 = arith.select %79, %85, %72 : vector<16x128xi1>, vector<16x128xf32>
    %87 = arith.select %76, %73, %86 : vector<16x128xi1>, vector<16x128xf32>
    %cst_28 = arith.constant 0.000000e+00 : f32
    %88 = vector.broadcast %cst_28 : f32 to vector<16x128xf32>
    %89 = arith.cmpf oeq, %87, %88 : vector<16x128xf32>
    %cst_29 = arith.constant 1.000000e+00 : f32
    %90 = vector.broadcast %cst_29 : f32 to vector<16x128xf32>
    %91 = arith.select %89, %90, %87 : vector<16x128xi1>, vector<16x128xf32>
    %92 = arith.divf %84, %91 : vector<16x128xf32>
    %cst_30 = arith.constant 0.785398185 : f32
    %cst_31 = arith.constant 0.000000e+00 : f32
    %93 = vector.broadcast %cst_30 : f32 to vector<16x128xf32>
    %94 = vector.broadcast %cst_31 : f32 to vector<16x128xf32>
    %95 = arith.select %79, %93, %94 : vector<16x128xi1>, vector<16x128xf32>
    %cst_32 = arith.constant 1.57079637 : f32
    %96 = vector.broadcast %cst_32 : f32 to vector<16x128xf32>
    %97 = arith.select %76, %96, %95 : vector<16x128xi1>, vector<16x128xf32>
    %98 = arith.mulf %92, %92 : vector<16x128xf32>
    %cst_33 = arith.constant 0.0805374458 : f32
    %99 = vector.broadcast %cst_33 : f32 to vector<16x128xf32>
    %100 = arith.mulf %99, %98 : vector<16x128xf32>
    %cst_34 = arith.constant 0.138776854 : f32
    %101 = vector.broadcast %cst_34 : f32 to vector<16x128xf32>
    %102 = arith.subf %100, %101 : vector<16x128xf32>
    %103 = arith.mulf %102, %98 : vector<16x128xf32>
    %cst_35 = arith.constant 0.199777111 : f32
    %104 = vector.broadcast %cst_35 : f32 to vector<16x128xf32>
    %105 = arith.addf %103, %104 : vector<16x128xf32>
    %106 = arith.mulf %105, %98 : vector<16x128xf32>
    %cst_36 = arith.constant 0.333329499 : f32
    %107 = vector.broadcast %cst_36 : f32 to vector<16x128xf32>
    %108 = arith.subf %106, %107 : vector<16x128xf32>
    %109 = arith.addf %97, %92 : vector<16x128xf32>
    %110 = arith.mulf %92, %98 : vector<16x128xf32>
    %111 = arith.mulf %110, %108 : vector<16x128xf32>
    %112 = arith.addf %109, %111 : vector<16x128xf32>
    %cst_37 = arith.constant 0.000000e+00 : f32
    %113 = vector.broadcast %cst_37 : f32 to vector<16x128xf32>
    %114 = arith.cmpf olt, %8, %113 : vector<16x128xf32>
    %cst_38 = arith.constant 3.14159274 : f32
    %115 = vector.broadcast %cst_38 : f32 to vector<16x128xf32>
    %116 = arith.subf %115, %112 : vector<16x128xf32>
    %117 = arith.select %114, %116, %112 : vector<16x128xi1>, vector<16x128xf32>
    %cst_39 = arith.constant 0.000000e+00 : f32
    %118 = vector.broadcast %cst_39 : f32 to vector<16x128xf32>
    %119 = arith.cmpf olt, %10, %118 : vector<16x128xf32>
    %cst_40 = arith.constant 0.000000e+00 : f32
    %120 = vector.broadcast %cst_40 : f32 to vector<16x128xf32>
    %121 = arith.subf %120, %117 : vector<16x128xf32>
    %122 = arith.select %119, %121, %117 : vector<16x128xi1>, vector<16x128xf32>
    %123 = arith.subf %71, %122 : vector<16x128xf32>
    %124 = arith.mulf %20, %20 : vector<16x128xf32>
    %125 = arith.mulf %123, %123 : vector<16x128xf32>
    %126 = arith.addf %124, %125 : vector<16x128xf32>
    %c0_41 = arith.constant 0 : index
    %c0_42 = arith.constant 0 : index
    %127 = vector.load %arg3[%c0_41, %c0_42] : memref<8x128xf32, #tpu.memory_space<vmem>>, vector<8x128xf32>
    %128 = vector.shape_cast %126 : vector<16x128xf32> to vector<2x8x128xf32>
    %cst_43 = arith.constant dense<0.000000e+00> : vector<8x128xf32>
    %129 = vector.multi_reduction <add>, %128, %cst_43 [0] : vector<2x8x128xf32> to vector<8x128xf32>
    %130 = arith.addf %127, %129 : vector<8x128xf32>
    %c0_44 = arith.constant 0 : index
    %c0_45 = arith.constant 0 : index
    %131 = vector.load %arg3[%c0_44, %c0_45] : memref<8x128xf32, #tpu.memory_space<vmem>>, vector<8x128xf32>
    tpu.vector_store %arg3[%c0_44, %c0_45], %130 {strides = array<i32>} : memref<8x128xf32, #tpu.memory_space<vmem>>, vector<8x128xf32>,
    return
  }
  func.func @transform_0(%arg0: i32, %arg1: i32) -> (i32, i32, i32) {
    %c1_i32 = arith.constant 1 : i32
    %0 = arith.muli %arg0, %c1_i32 : i32
    %1 = arith.addi %0, %arg1 : i32
    %c0_i32 = arith.constant 0 : i32
    %c0_i32_0 = arith.constant 0 : i32
    %c0_i32_1 = arith.constant 0 : i32
    return %c0_i32, %1, %c0_i32_0 : i32, i32, i32
  }
  func.func @transform_1(%arg0: i32, %arg1: i32) -> (i32, i32) {
    %c0_i32 = arith.constant 0 : i32
    %c0_i32_0 = arith.constant 0 : i32
    return %arg0, %c0_i32 : i32, i32
  }
}

</mosaic_0001>

<bundles_post_ra>
// kernel: custom-call
= control target key start
LH: loop header
LB: loop body
LE: loop exit
PB: predicated region body
PF: predicated region fallthrough
CT: control target
= control target key end

     0   :  { %2 = vsyncpa [#allocation0], 0  ;;  %s47_s0 = inlined_call_operand.hbm [shape: c64[2,4,16,16], index: 0, kind: input, shape index: {}]   ;;  %s48_s1 = inlined_call_operand.vmem [shape: f32[2,4,16,16], index: 1, kind: output, shape index: {}]  }
   0x1   :  { %s3_s8 = sshll.u32 %s48_s1, 4  ;;  %s4_s8 = int_to_ptr.vmem [resolvable:$true] %s3_s8 }
   0x2   :  { %s17_s9 = scalar_lea.vmem %s4_s8, 2048  ;;  %p22_p1 = scmp.lt.s32.totalorder %s4_s8, %s4_s8 }
   0x3   :  { %p18_p0 = scmp.ne.s32.totalorder %s4_s8, %s17_s9  ;;  %p23_p2 = scmp.lt.s32.totalorder %s17_s9, %s17_s9 }
   0x5   :  { %p24_p3 = por %p23_p2, %p22_p1 }
   0x7   :  { %p25_p4 = pnand %p24_p3, %p18_p0 }
   0x9   :  { %28 = shalt.err (!%p25_p4)  }
   0xa   :  { %6 = dma.hbm_to_vmem [thread:$0]  %s47_s0, 2048, %s4_s8, [#allocation0] }
   0xb   :  { %29 = dma.done.wait [#allocation0], 2048  }
   0xc   :  { %30 = vsyncadd [#allocation0], 4294965248 }
   0xd   :  { %8 = vsyncpa [#allocation0], 1 }

// kernel: custom-call.1
= control target key start
LH: loop header
LB: loop body
LE: loop exit
PB: predicated region body
PF: predicated region fallthrough
CT: control target
= control target key end

     0   :  { %s51_s0 = inlined_call_operand.hbm [shape: c64[2,4,16,16], index: 0, kind: input, shape index: {}]   ;;  %s52_s1 = inlined_call_operand.vmem [shape: f32[2,4,16,16], index: 1, kind: output, shape index: {}]  }
   0x1   :  { %s2_s8 = scalar_lea.hbm %s51_s0, 2048 }
   0x2   :  { %3 = vsyncpa [#allocation0], 0  ;;  %s4_s11 = sshll.u32 %s52_s1, 4  ;;  %s5_s11 = int_to_ptr.vmem [resolvable:$true] %s4_s11 }
   0x3   :  { %s20_s12 = scalar_lea.vmem %s5_s11, 2048  ;;  %p25_p1 = scmp.lt.s32.totalorder %s5_s11, %s5_s11 }
   0x4   :  { %p21_p0 = scmp.ne.s32.totalorder %s5_s11, %s20_s12  ;;  %p26_p2 = scmp.lt.s32.totalorder %s20_s12, %s20_s12 }
   0x6   :  { %p27_p3 = por %p26_p2, %p25_p1 }
   0x8   :  { %p28_p4 = pnand %p27_p3, %p21_p0 }
   0xa   :  { %31 = shalt.err (!%p28_p4)  }
   0xb   :  { %7 = dma.hbm_to_vmem [thread:$0]  %s2_s8, 2048, %s5_s11, [#allocation0] }
   0xc   :  { %33 = dma.done.wait [#allocation0], 2048  }
   0xd   :  { %34 = vsyncadd [#allocation0], 4294965248 }
   0xe   :  { %9 = vsyncpa [#allocation0], 1 }

// kernel: cv_log_error.1
= control target key start
LH: loop header
LB: loop body
LE: loop exit
PB: predicated region body
PF: predicated region fallthrough
CT: control target
= control target key end

     0   :  { %s511_s0 = inlined_call_operand.vmem [shape: f32[4,16,128], index: 0, kind: input, shape index: {}]   ;;  %s512_s1 = inlined_call_operand.vmem [shape: f32[8,128], index: 1, kind: output, shape index: {}]  }
   0x1   :  { %v279_v0 = vld [vmem:[%s511_s0] sm:$0xff]  ;;  %v284_v1 = vld [vmem:[%s511_s0 + $0x8] sm:$0xff]  ;;  %v289_v2 = vld [vmem:[%s511_s0 + $0x10] sm:$0xff] }
   0x2   :  { %v294_v3 = vld [vmem:[%s511_s0 + $0x18] sm:$0xff]  ;;  %v297_v4 = vand.u32 2147483647, %v279_v0  ;;  %v300_v5 = vand.u32 2147483647, %v284_v1  ;;  %v343_v16 = vld [vmem:[%s511_s0 + $0x20] sm:$0xff]  ;;  %v46_v57 = vmul.f32 %v279_v0, %v279_v0  ;;  %v48_v58 = vmul.f32 %v289_v2, %v289_v2 }
   0x3   :  { %v303_v6 = vand.u32 2147483647, %v289_v2  ;;  %v306_v7 = vand.u32 2147483647, %v294_v3  ;;  %v348_v17 = vld [vmem:[%s511_s0 + $0x28] sm:$0xff]  ;;  %v353_v18 = vld [vmem:[%s511_s0 + $0x30] sm:$0xff]  ;;  %v52_v22 = vmul.f32 %v343_v16, %v343_v16  ;;  %v47_v61 = vmul.f32 %v284_v1, %v284_v1 }
   0x4   :  { %v309_v8 = vmul.f32 2.4142137, %v297_v4  ;;  %v312_v9 = vmul.f32 2.4142137, %v300_v5  ;;  %v315_v10 = vmul.f32 0.41421357, %v297_v4  ;;  %v53_v23 = vmul.f32 %v348_v17, %v348_v17 }
   0x5   :  { %v318_v11 = vmul.f32 0.41421357, %v300_v5  ;;  %v88_v12 = vadd.f32 %v303_v6, %v297_v4  ;;  %v89_v13 = vadd.f32 %v306_v7, %v300_v5  ;;  %v366_v21 = vld [vmem:[%s511_s0 + $0x38] sm:$0xff]  ;;  %v54_v24 = vmul.f32 %v353_v18, %v353_v18 }
   0x6   :  { %vm78_vm0 = vcmp.gt.f32.partialorder %v303_v6, %v315_v10  ;;  %vm74_vm2 = vcmp.gt.f32.partialorder %v303_v6, %v309_v8  ;;  %vm75_vm3 = vcmp.gt.f32.partialorder %v306_v7, %v312_v9  ;;  %v55_v25 = vmul.f32 %v366_v21, %v366_v21 }
   0x7   :  { %vm79_vm1 = vcmp.gt.f32.partialorder %v306_v7, %v318_v11  ;;  %v90_v14 = vsel %vm78_vm0, %v88_v12, %v297_v4  ;;  %v377_v28 = vand.u32 2147483647, %v343_v16  ;;  %v380_v29 = vand.u32 2147483647, %v348_v17 }
   0x8   :  { %v91_v15 = vsel %vm79_vm1, %v89_v13, %v300_v5  ;;  %v92_v19 = vsel %vm74_vm2, %v303_v6, %v90_v14  ;;  %v383_v30 = vand.u32 2147483647, %v353_v18  ;;  %v386_v31 = vand.u32 2147483647, %v366_v21 }
   0x9   :  { %v93_v20 = vsel %vm75_vm3, %v306_v7, %v91_v15  ;;  %vm94_vm4 = vcmp.eq.f32.partialorder %v92_v19, 0.0  ;;  %v389_v32 = vmul.f32 2.4142137, %v377_v28  ;;  %v392_v33 = vmul.f32 2.4142137, %v380_v29 }
   0xa   :  { %vm95_vm5 = vcmp.eq.f32.partialorder %v93_v20, 0.0  ;;  %v96_v26 = vsel %vm94_vm4, 1.0, %v92_v19  ;;  %v395_v34 = vmul.f32 0.41421357, %v377_v28  ;;  %v56_v35 = vadd.f32 %v54_v24, %v52_v22 }
   0xb   :  { %v97_v27 = vsel %vm95_vm5, 1.0, %v93_v20  ;;  %249 = vrcp.f32 %v96_v26  ;;  %v57_v36 = vadd.f32 %v55_v25, %v53_v23  ;;  %v398_v37 = vmul.f32 0.41421357, %v380_v29 }
   0xc   :  { %251 = vrcp.f32 %v97_v27  ;;  %v82_v38 = vsub.f32 %v303_v6, %v297_v4  ;;  %vm146_vm6 = vcmp.gt.f32.partialorder %v383_v30, %v389_v32  ;;  %vm150_vm7 = vcmp.gt.f32.partialorder %v383_v30, %v395_v34 }
   0xd   :  { %v160_v39 = vadd.f32 %v383_v30, %v377_v28  ;;  %v83_v40 = vsub.f32 %v306_v7, %v300_v5  ;;  %vm147_vm8 = vcmp.gt.f32.partialorder %v386_v31, %v392_v33  ;;  %vm151_vm9 = vcmp.gt.f32.partialorder %v386_v31, %v398_v37 }
   0xe   :  { %v161_v41 = vadd.f32 %v386_v31, %v380_v29  ;;  %v80_v42 = vsub.f32 0.0, %v297_v4  ;;  %253 = vrcp.f32 %v56_v35  ;;  %v81_v44 = vsub.f32 0.0, %v300_v5 }
   0xf   :  { %v162_v43 = vsel %vm150_vm7, %v160_v39, %v377_v28  ;;  %255 = vrcp.f32 %v57_v36  ;;  %v84_v47 = vsel %vm78_vm0, %v82_v38, %v303_v6  ;;  %v85_v49 = vsel %vm79_vm1, %v83_v40, %v306_v7 }
  0x10   :  { %v163_v45 = vsel %vm151_vm9, %v161_v41, %v380_v29  ;;  %v164_v46 = vsel %vm146_vm6, %v383_v30, %v162_v43  ;;  %v86_v52 = vsel %vm74_vm2, %v80_v42, %v84_v47  ;;  %v87_v53 = vsel %vm75_vm3, %v81_v44, %v85_v49 }
  0x11   :  { %v165_v48 = vsel %vm147_vm8, %v386_v31, %v163_v45  ;;  %vm166_vm10 = vcmp.eq.f32.partialorder %v164_v46, 0.0  ;;  %v154_v60 = vsub.f32 %v383_v30, %v377_v28  ;;  %v49_v62 = vmul.f32 %v294_v3, %v294_v3 }
  0x12   :  { %vm167_vm11 = vcmp.eq.f32.partialorder %v165_v48, 0.0  ;;  %v168_v50 = vsel %vm166_vm10, 1.0, %v164_v46  ;;  %v155_v4 = vsub.f32 %v386_v31, %v380_v29  ;;  %v152_v13 = vsub.f32 0.0, %v377_v28 }
  0x13   :  { %v169_v51 = vsel %vm167_vm11, 1.0, %v165_v48  ;;  %257 = vrcp.f32 %v168_v50  ;;  %v50_v14 = vadd.f32 %v48_v58, %v46_v57  ;;  %v153_v19 = vsub.f32 0.0, %v380_v29 }
  0x14   :  { %259 = vrcp.f32 %v169_v51  ;;  %v156_v20 = vsel %vm150_vm7, %v154_v60, %v383_v30  ;;  %v51_v23 = vadd.f32 %v49_v62, %v47_v61  ;;  %v157_v25 = vsel %vm151_vm9, %v155_v4, %v386_v31 }
  0x15   :  { %v265_v28 = vmov 0.0   ;;  %v158_v36 = vsel %vm146_vm6, %v152_v13, %v156_v20  ;;  %v159_v41 = vsel %vm147_vm8, %v153_v19, %v157_v25  ;;  %vm128_vm12 = vcmp.lt.f32.partialorder %v279_v0, 0.0 }
  0x16   :  { %v102_v29 = vsel %vm78_vm0, 0.7853982, %v265_v28  ;;  %v103_v39 = vsel %vm79_vm1, 0.7853982, %v265_v28  ;;  %v175_v13 = vsel %vm151_vm9, 0.7853982, %v265_v28 }
  0x17   :  { %v104_v45 = vsel %vm74_vm2, 1.5707964, %v102_v29  ;;  %v105_v11 = vsel %vm75_vm3, 1.5707964, %v103_v39  ;;  %v177_v20 = vsel %vm147_vm8, 1.5707964, %v175_v13 }
  0x18   :  { %v250_v54 = vpop.eup %249  ;;  %vm129_vm13 = vcmp.lt.f32.partialorder %v284_v1, 0.0  ;;  %vm200_vm14 = vcmp.lt.f32.partialorder %v343_v16, 0.0  ;;  %vm134_vm15 = vcmp.lt.f32.partialorder %v289_v2, 0.0  ;;  %vm201_vm0 = vcmp.lt.f32.partialorder %v348_v17, 0.0 }
  0x19   :  { %v252_v55 = vpop.eup %251  ;;  %v99_v56 = vmul.f32 %v250_v54, %v86_v52  ;;  %vm135_vm1 = vcmp.lt.f32.partialorder %v294_v3, 0.0  ;;  %vm206_vm2 = vcmp.lt.f32.partialorder %v353_v18, 0.0  ;;  %vm207_vm3 = vcmp.lt.f32.partialorder %v366_v21, 0.0 }
  0x1a   :  { %v101_v59 = vmul.f32 %v252_v55, %v87_v53 }
  0x1b   :  { %v106_v63 = vmul.f32 %v99_v56, %v99_v56  ;;  %v254_v22 = vpop.eup %253  ;;  %v120_v58 = vadd.f32 %v104_v45, %v99_v56 }
  0x1c   :  { %v107_v5 = vmul.f32 %v101_v59, %v101_v59  ;;  %v256_v26 = vpop.eup %255  ;;  %v59_v38 = vmul.f32 %v254_v22, %v50_v14  ;;  %v121_v8 = vadd.f32 %v105_v11, %v101_v59 }
  0x1d   :  { %v108_v12 = vmul.f32 0.080537446, %v106_v63  ;;  %v61_v43 = vmul.f32 %v256_v26, %v51_v23  ;;  %v122_v49 = vmul.f32 %v106_v63, %v99_v56 }
  0x1e   :  { %v109_v15 = vmul.f32 0.080537446, %v107_v5  ;;  %261 = vlog2.f32 %v59_v38  ;;  %v123_v52 = vmul.f32 %v107_v5, %v101_v59 }
  0x1f   :  { %v240_v24 = vadd.f32 -0.13877685, %v108_v12  ;;  %263 = vlog2.f32 %v61_v43 }
  0x20   :  { %v241_v27 = vadd.f32 -0.13877685, %v109_v15  ;;  %v258_v42 = vpop.eup %257 }
  0x21   :  { %v112_v35 = vmul.f32 %v240_v24, %v106_v63  ;;  %v260_v10 = vpop.eup %259  ;;  %v171_v47 = vmul.f32 %v258_v42, %v158_v36 }
  0x22   :  { %v113_v40 = vmul.f32 %v241_v27, %v107_v5  ;;  %v173_v50 = vmul.f32 %v260_v10, %v159_v41 }
  0x23   :  { %v114_v44 = vadd.f32 0.19977711, %v112_v35  ;;  %v178_v53 = vmul.f32 %v171_v47, %v171_v47 }
  0x24   :  { %v115_v46 = vadd.f32 0.19977711, %v113_v40  ;;  %v179_v55 = vmul.f32 %v173_v50, %v173_v50  ;;  %v193_v32 = vadd.f32 %v177_v20, %v173_v50 }
  0x25   :  { %v116_v48 = vmul.f32 %v114_v44, %v106_v63  ;;  %v180_v6 = vmul.f32 0.080537446, %v178_v53  ;;  %v174_v63 = vsel %vm150_vm7, 0.7853982, %v265_v28  ;;  %v194_v22 = vmul.f32 %v178_v53, %v171_v47 }
  0x26   :  { %v117_v51 = vmul.f32 %v115_v46, %v107_v5  ;;  %v181_v61 = vmul.f32 0.080537446, %v179_v55  ;;  %v176_v59 = vsel %vm146_vm6, 1.5707964, %v174_v63  ;;  %v195_v37 = vmul.f32 %v179_v55, %v173_v50 }
  0x27   :  { %v242_v54 = vadd.f32 -0.3333295, %v116_v48  ;;  %v244_v4 = vadd.f32 -0.13877685, %v180_v6  ;;  %v192_v26 = vadd.f32 %v176_v59, %v171_v47 }
  0x28   :  { %v243_v57 = vadd.f32 -0.3333295, %v117_v51  ;;  %v245_v7 = vadd.f32 -0.13877685, %v181_v61 }
  0x29   :  { %v124_v60 = vmul.f32 %v242_v54, %v122_v49  ;;  %v184_v12 = vmul.f32 %v244_v4, %v178_v53 }
  0x2a   :  { %v125_v62 = vmul.f32 %v243_v57, %v123_v52  ;;  %v185_v14 = vmul.f32 %v245_v7, %v179_v55 }
  0x2b   :  { %v126_v9 = vadd.f32 %v124_v60, %v120_v58  ;;  %v186_v56 = vadd.f32 0.19977711, %v184_v12  ;;  %v262_v27 = vpop.eup %261 }
  0x2c   :  { %v127_v5 = vadd.f32 %v125_v62, %v121_v8  ;;  %v187_v15 = vadd.f32 0.19977711, %v185_v14  ;;  %v264_v28 = vpop.eup %263  ;;  %v63_v33 = vmul.f32 0.6931472, %v262_v27 }
  0x2d   :  { %v130_v19 = vsub.f32 3.1415927, %v126_v9  ;;  %v188_v34 = vmul.f32 %v186_v56, %v178_v53  ;;  %v65_v39 = vmul.f32 0.6931472, %v264_v28 }
  0x2e   :  { %v131_v23 = vsub.f32 3.1415927, %v127_v5  ;;  %v189_v24 = vmul.f32 %v187_v15, %v179_v55  ;;  %v66_v43 = vmul.f32 0.5, %v63_v33 }
  0x2f   :  { %v246_v25 = vadd.f32 -0.3333295, %v188_v34  ;;  %v132_v29 = vsel %vm128_vm12, %v130_v19, %v126_v9  ;;  %v67_v10 = vmul.f32 0.5, %v65_v39 }
  0x30   :  { %v247_v30 = vadd.f32 -0.3333295, %v189_v24  ;;  %v133_v36 = vsel %vm129_vm13, %v131_v23, %v127_v5  ;;  %v136_v40 = vsub.f32 0.0, %v132_v29  ;;  %v214_v17 = vmul.f32 %v66_v43, %v66_v43 }
  0x31   :  { %v196_v35 = vmul.f32 %v246_v25, %v194_v22  ;;  %v137_v1 = vsub.f32 0.0, %v133_v36  ;;  %v215_v51 = vmul.f32 %v67_v10, %v67_v10 }
  0x32   :  { %v197_v31 = vmul.f32 %v247_v30, %v195_v37  ;;  %v138_v45 = vsel %vm134_vm15, %v136_v40, %v132_v29 }
  0x33   :  { %v198_v38 = vadd.f32 %v196_v35, %v192_v26  ;;  %v139_v16 = vsel %vm135_vm1, %v137_v1, %v133_v36 }
  0x34   :  { %v199_v0 = vadd.f32 %v197_v31, %v193_v32 }
  0x35   :  { %v202_v41 = vsub.f32 3.1415927, %v198_v38 }
  0x36   :  { %v203_v42 = vsub.f32 3.1415927, %v199_v0 }
  0x37   :  { %v204_v44 = vsel %vm200_vm14, %v202_v41, %v198_v38 }
  0x38   :  { %v205_v46 = vsel %vm201_vm0, %v203_v42, %v199_v0  ;;  %v208_v47 = vsub.f32 0.0, %v204_v44 }
  0x39   :  { %v209_v11 = vsub.f32 0.0, %v205_v46 }
  0x3a   :  { %v210_v2 = vsel %vm206_vm2, %v208_v47, %v204_v44 }
  0x3b   :  { %v211_v48 = vsel %vm207_vm3, %v209_v11, %v205_v46  ;;  %v212_v49 = vsub.f32 %v138_v45, %v210_v2 }
  0x3c   :  { %v213_v50 = vsub.f32 %v139_v16, %v211_v48 }
  0x3d   :  { %v216_v3 = vmul.f32 %v212_v49, %v212_v49 }
  0x3e   :  { %v217_v52 = vmul.f32 %v213_v50, %v213_v50 }
  0x3f   :  { %v218_v53 = vadd.f32 %v216_v3, %v214_v17 }
  0x40   :  { %v219_v54 = vadd.f32 %v217_v52, %v215_v51 }
  0x42   :  { %v221_v55 = vadd.f32 %v219_v54, %v218_v53 }
  0x44   :  { %223 = vst [vmem:[%s512_s1] sm:$0xff] %v221_v55 }

</bundles_post_ra>
